<compile_context>
chip_gen: v6e
topology: v6e:2x2x1
jax: 0.10.0
libtpu: 0.0.40
codegen_flags: <defaults>
</compile_context>

<pallas_src>
import jax
import jax.numpy as jnp
from jax.experimental import pallas as pl
from jax.experimental.pallas import tpu as pltpu


def _pos_soft_assign_kernel(alpha_ref, x_ref, o_ref):
    # alpha_ref: (1,) scalar in SMEM (scalar prefetch).
    # x_ref / o_ref: (1, C, TILE_HW) VMEM tiles.  Reduce over axis=1 (channels).
    alpha = alpha_ref[0]
    x = x_ref[...].astype(jnp.float32)
    x_max = jnp.max(x, axis=1, keepdims=True)
    exp_x = jnp.exp(alpha * (x - x_max))
    denom = jnp.sum(exp_x, axis=1, keepdims=True)
    # Exact reciprocal: one reciprocal per HW column, then C multiplies.
    # (approx=True fails the sum-to-1 property within ~1e-3.)
    inv = pl.reciprocal(denom, approx=False)
    o_ref[...] = (exp_x * inv).astype(o_ref.dtype)


def _round_up(x, m):
    return (x + m - 1) // m * m


def _choose_tile_hw(C, HW, itemsize, max_tile=2048, vmem_budget=8 * 1024 * 1024):
    """Pick a lane-dense HW tile that keeps total VMEM use conservative.

    Budget accounts for double-buffered input + output tiles (io dtype, C
    padded to the 8-sublane granule) plus ~3 f32 intermediates inside the
    kernel.  8 MiB total stays well under v5e's 16 MiB scoped default and
    v7x's 64 MiB physical VMEM while still amortizing per-step overhead.
    """
    c_pad = _round_up(C, 8)                         # sublane padding (f32-worst-case)
    bytes_per_col = c_pad * (4 * itemsize + 3 * 4)  # 2x2 io buffers + 3 f32 temps
    cols = max(128, (vmem_budget // bytes_per_col) // 128 * 128)
    return int(min(_round_up(HW, 128), min(cols, max_tile)))


def pos_soft_assign(x, alpha=1.0, dims=1):
    """Pallas implementation of PosSoftAssign.forward for NCHW inputs, dims=1."""
    assert dims == 1, "kernel is specialized for channel-dim softmax (dims=1)"
    N, C, H, W = x.shape
    HW = H * W
    x2 = x.reshape(N, C, HW)

    itemsize = jnp.dtype(x.dtype).itemsize
    tile_hw = _choose_tile_hw(C, HW, itemsize)
    num_hw_tiles = pl.cdiv(HW, tile_hw)
    HW_pad = num_hw_tiles * tile_hw
    if HW_pad != HW:
        # Padded columns compute a valid (uniform) softmax over C and are
        # sliced off afterwards; keeps every block full and stores unmasked.
        x2 = jnp.pad(x2, ((0, 0), (0, 0), (0, HW_pad - HW)))

    alpha_arr = jnp.full((1,), alpha, dtype=jnp.float32)

    out = pl.pallas_call(
        _pos_soft_assign_kernel,
        out_shape=jax.ShapeDtypeStruct((N, C, HW_pad), x.dtype),
        grid_spec=pltpu.PrefetchScalarGridSpec(
            num_scalar_prefetch=1,            # alpha lands in SMEM
            grid=(N, num_hw_tiles),
            in_specs=[
                pl.BlockSpec((1, C, tile_hw), lambda n, h, alpha_ref: (n, 0, h)),
            ],
            out_specs=pl.BlockSpec((1, C, tile_hw), lambda n, h, alpha_ref: (n, 0, h)),
        ),
        compiler_params=pltpu.CompilerParams(
            dimension_semantics=("parallel", "parallel"),  # megacore-shardable
        ),
    )(alpha_arr, x2)

    if HW_pad != HW:
        out = out[:, :, :HW]
    return out.reshape(N, C, H, W)


if __name__ == "__main__":
    key = jax.random.PRNGKey(0)
    N, C, H, W = 2, 4, 16, 16
    x = jax.random.normal(key, (N, C, H, W), dtype=jnp.float32)

    alpha = 2.5  # exercise the runtime-alpha path of forward(x, alpha)
    y = pos_soft_assign(x, alpha=alpha, dims=1)
    y = jax.block_until_ready(y)

    # Pure-JAX reference for a correctness sanity check.
    x_max = jnp.max(x, axis=1, keepdims=True)
    e = jnp.exp(alpha * (x - x_max))
    ref = e / jnp.sum(e, axis=1, keepdims=True)

    assert y.shape == (N, C, H, W)
    assert jnp.allclose(y, ref, atol=1e-5, rtol=1e-5)
    # soft-assignment sums to 1 over channels (exact reciprocal => tight tol)
    assert jnp.allclose(jnp.sum(y, axis=1), jnp.ones((N, H, W)), atol=1e-5)

    # Also exercise the non-128-multiple spatial (padding) path and default alpha.
    x_odd = jax.random.normal(jax.random.PRNGKey(1), (2, 8, 10, 10), dtype=jnp.float32)
    y_odd = jax.block_until_ready(pos_soft_assign(x_odd, alpha=1.0, dims=1))
    e_odd = jnp.exp(x_odd - jnp.max(x_odd, axis=1, keepdims=True))
    ref_odd = e_odd / jnp.sum(e_odd, axis=1, keepdims=True)
    assert jnp.allclose(y_odd, ref_odd, atol=1e-5, rtol=1e-5)
    assert jnp.allclose(jnp.sum(y_odd, axis=1), jnp.ones((2, 10, 10)), atol=1e-5)

    print("KERNEL_OK")
</pallas_src>

<mosaic_0001>
module attributes {stable_mosaic.version = 11 : i64} {
  func.func @_pos_soft_assign_kernel(%arg0: i32, %arg1: i32, %arg2: memref<1xf32, #tpu.memory_space<smem>>, %arg3: memref<1x4x256xf32, #tpu.memory_space<vmem>>, %arg4: memref<1x4x256xf32, #tpu.memory_space<vmem>>) attributes {dimension_semantics = [#tpu.dimension_semantics<parallel>, #tpu.dimension_semantics<parallel>], iteration_bounds = array<i64: 2, 1>, scalar_prefetch = 1 : i64, scratch_operands = 0 : i64, tpu.core_type = #tpu.core_type<tc>, window_params = [{transform_indices = @transform_0, window_bounds = array<i64: 1, 4, 256>}, {transform_indices = @transform_1, window_bounds = array<i64: 1, 4, 256>}]} {
    %c0 = arith.constant 0 : index
    %0 = memref.load %arg2[%c0] : memref<1xf32, #tpu.memory_space<smem>>
    %c0_0 = arith.constant 0 : index
    %c0_1 = arith.constant 0 : index
    %c0_2 = arith.constant 0 : index
    %1 = vector.load %arg3[%c0_0, %c0_1, %c0_2] : memref<1x4x256xf32, #tpu.memory_space<vmem>>, vector<1x4x256xf32>
    %cst = arith.constant dense<0xFF800000> : vector<1x256xf32>
    %2 = vector.multi_reduction <maximumf>, %1, %cst [1] : vector<1x4x256xf32> to vector<1x256xf32>
    %3 = vector.shape_cast %2 : vector<1x256xf32> to vector<1x1x256xf32>
    %4 = vector.broadcast %3 : vector<1x1x256xf32> to vector<1x4x256xf32>
    %5 = arith.subf %1, %4 : vector<1x4x256xf32>
    %6 = vector.broadcast %0 : f32 to vector<1x4x256xf32>
    %7 = arith.mulf %6, %5 : vector<1x4x256xf32>
    %8 = math.exp %7 : vector<1x4x256xf32>
    %cst_3 = arith.constant dense<0.000000e+00> : vector<1x256xf32>
    %9 = vector.multi_reduction <add>, %8, %cst_3 [1] : vector<1x4x256xf32> to vector<1x256xf32>
    %10 = vector.shape_cast %9 : vector<1x256xf32> to vector<1x1x256xf32>
    %11 = tpu.reciprocal %10 : vector<1x1x256xf32> -> vector<1x1x256xf32>
    %12 = vector.broadcast %11 : vector<1x1x256xf32> to vector<1x4x256xf32>
    %13 = arith.mulf %8, %12 : vector<1x4x256xf32>
    %c0_4 = arith.constant 0 : index
    %c0_5 = arith.constant 0 : index
    %c0_6 = arith.constant 0 : index
    %14 = vector.load %arg4[%c0_4, %c0_5, %c0_6] : memref<1x4x256xf32, #tpu.memory_space<vmem>>, vector<1x4x256xf32>
    tpu.vector_store %arg4[%c0_4, %c0_5, %c0_6], %13 {strides = array<i32>} : memref<1x4x256xf32, #tpu.memory_space<vmem>>, vector<1x4x256xf32>,
    return
  }
  func.func @transform_0(%arg0: i32, %arg1: i32, %arg2: memref<1xf32, #tpu.memory_space<smem>>) -> (i32, i32, i32) {
    %c0_i32 = arith.constant 0 : i32
    %c0_i32_0 = arith.constant 0 : i32
    return %arg0, %c0_i32, %arg1 : i32, i32, i32
  }
  func.func @transform_1(%arg0: i32, %arg1: i32, %arg2: memref<1xf32, #tpu.memory_space<smem>>) -> (i32, i32, i32) {
    %c0_i32 = arith.constant 0 : i32
    %c0_i32_0 = arith.constant 0 : i32
    return %arg0, %c0_i32, %arg1 : i32, i32, i32
  }
}

</mosaic_0001>

<bundles_post_ra>
// kernel: tpu_custom_call.1
= control target key start
LH: loop header
LB: loop body
LE: loop exit
PB: predicated region body
PF: predicated region fallthrough
CT: control target
= control target key end

     0   :  { %s668_s0 = inlined_call_operand.<no memory space> [shape: f32[1], index: 0, kind: input, shape index: {}]   ;;  %s669_s1 = inlined_call_operand.hbm [shape: f32[2,4,256], index: 1, kind: input, shape index: {}]   ;;  %s670_s2 = inlined_call_operand.hbm [shape: f32[2,4,256], index: 2, kind: output, shape index: {}]  }
   0x1   :  { %7 = sst [smem:[#allocation3]] %s668_s0 }
   0x2   :  { %8 = vsyncpa [#allocation5], 0 }
   0x3   :  { %10 = vsyncpa [#allocation5 + $0x1], 0 }
   0x4   :  { %11 = vsyncpa [#allocation6], 0 }
   0x5   :  { %13 = vsyncpa [#allocation6 + $0x1], 0  ;;  %s526_s11 = smov 0   ;;  %s528_s12 = smov 0  }
   0x6   :  { %s530_s13 = smov 0   ;;  %s532_s14 = smov 0  }
   0x7   :  { %s534_s15 = smov 0   ;;  %s536_s16 = smov 0  }
   0x8 LB: > { %s310_s0 = sadd.s32 4294967295, %s504_s16   ;;  %s311_s17 = sadd.s32 4294967294, %s504_s16   ;;  %s504_s16 = sphi %s536_s16, %s19_s16   ;;  %s500_s15 = sphi %s534_s15, %s682_s15   ;;  %s496_s14 = sphi %s532_s14, %s681_s14   ;;  %s492_s13 = sphi %s530_s13, %s680_s13   ;;  %s488_s12 = sphi %s528_s12, %s679_s12   ;;  %s484_s11 = sphi %s526_s11, %s678_s11  }
   0x9   : > { %s31_s18 = sadd.s32 1, %s500_s15  ;;  %s40_s19 = sadd.s32 1, %s492_s13 }
   0xa   : > { %p33_p0 = scmp.ge.s32.totalorder %s31_s18, 2  ;;  %p47_p1 = scmp.ne.s32.totalorder %s492_s13, %s488_s12 }
   0xb   : > { %p48_p2 = scmp.eq.s32.totalorder %s504_s16, 0  ;;  %p53_p3 = scmp.ne.s32.totalorder %s488_s12, %s484_s11 }
   0xc   : > { %s684_s18 = smov (%p33_p0, %s31_s18), 0  ;;  %p54_p5 = scmp.eq.s32.totalorder %s310_s0, 0 }
   0xd   : > { %p567_p4 = por %p48_p2, %p47_p1  ;;  %s35_s21 = ssub.s32 %s500_s15, %s684_s18 }
   0xe   : > { %p79_p6 = scmp.eq.s32.totalorder %s310_s0, 1  ;;  %p38_p7 = scmp.eq.s32.totalorder %s35_s21, 0 }
   0xf   : > { %p573_p8 = por %p54_p5, %p53_p3  ;;  %p85_p10 = scmp.eq.s32.totalorder %s311_s17, 1 }
  0x10   : > { %p577_p9 = por %p79_p6, %p47_p1  ;;  %p339_p13 = scmp.lt.s32.totalorder %s504_s16, 2 }
  0x11   : > { %s582_s24 = scalar_select %p38_p7, %s492_s13, %s40_s19  }
  0x12   : > { %p584_p11 = por %p85_p10, %p53_p3  ;;  %s105_s26 = sand.u32 1, %s492_s13  }
  0x13   : > { %s314_s27 = sshll.u32 %s105_s26, 3  ;;  %s325_s28 = sshll.u32 %s500_s15, 7 }
  0x14   : > { %s674_s25 = scalar_select %p584_p11, 1, 0 }
  0x15   : > { %s117_s3 = scalar_lea.hbm %s669_s1, %s325_s28  ;;  %s109_s4 = scalar_lea.vmem [#allocation4], %s314_s27 }
  0x16   : > { %s119_s5 = sshll.u32 %s109_s4, 4  ;;  %p597_p0 = pnand %p339_p13, %p567_p4  ;;  %s120_s5 = int_to_ptr.vmem [resolvable:$true] %s119_s5 }
  0x17   : > { %p317_p1 = scmp.ge.s32.totalorder %s504_s16, 1  ;;  %p124_p2 = scmp.lt.s32.totalorder %s504_s16, 3 }
  0x18   : > { %s106_s7 = scalar_lea.sflag [#allocation5], %s105_s26  ;;  %p398_p3 = pneg %p597_p0 }
  0x19   : > { %s409_s8 = scalar_lea.vmem %s120_s5, 128  ;;  %s506_s9 = smov [#allocation4]  }
  0x1a   : > { %p410_p5 = scmp.ne.s32.totalorder %s120_s5, %s409_s8  ;;  %s414_s10 = sshll.u32 %s506_s9, 4  ;;  %s415_s10 = int_to_ptr.vmem [resolvable:$false] %s414_s10 }
  0x1b   : > { %s416_s0 = scalar_lea.vmem %s415_s10, 256  ;;  %p417_p10 = scmp.lt.s32.totalorder %s120_s5, %s415_s10 }
  0x1c   : > { %p412_p6 = pnand %p410_p5, %p398_p3  ;;  %p418_p12 = scmp.lt.s32.totalorder %s416_s0, %s409_s8 }
  0x1e   : > { %p413_p7 = pneg %p412_p6  ;;  %p419_p4 = por %p418_p12, %p417_p10 }
  0x20   : > { %p420_p13 = pnand %p419_p4, %p413_p7 }
  0x22   : > { %423 = shalt.err (!%p420_p13)
}
  0x23   : > { %334 = dma.hbm_to_vmem [thread:$0]  (!%p597_p0), %s117_s3, 128, %s120_s5, %s106_s7  }
  0x24   : > { %p125_p11 = pnand %p317_p1, %p124_p2 }
  0x25   : > { %s612_s17 = sand.u32 (!%p125_p11), 1, %s488_s12  }
  0x26   : > { %128 = sbr.rel (%p125_p11) target bundleno = 128 (0x80), region = 24  ;;  %s318_s19 = sshll.u32 (!%p125_p11), %s612_s17, 3 }
  0x27   : > { %s131_s20 = scalar_lea.sflag (!%p125_p11), [#allocation5], %s612_s17  ;;  %s134_s21 = scalar_lea.vmem (!%p125_p11), [#allocation4], %s318_s19 }
  0x2b   : > { %475 = dma.done.wait (%p573_p8), %s131_s20, 128  }
  0x2c   : > { %477 = vsyncadd (%p573_p8), %s131_s20, 4294967168  ;;  %vm160_vm0 = vcmask 1043456   ;;  %v156_v0 = vld [vmem:[%s134_s21] sm:$0xff]  ;;  %s155_s26 = sld [smem:[#allocation3]]  ;;  %s152_s22 = scalar_lea.vmem [#allocation7], %s318_s19 }
  0x2d   : > { %v158_v1 = vcombine.high %v156_v0, %v156_v0  ;;  %v161_v2 = vsel %vm160_vm0, %v156_v0, -inf  ;;  %s226_s27 = sshll.u32 %s152_s22, 4  ;;  %s326_s28 = sshll.u32 %s496_s14, 7  ;;  %s227_s27 = int_to_ptr.vmem [resolvable:$true] %s226_s27 }
  0x2e   : > { %v162_v3 = vrot.slane %v161_v2, 4  ;;  %s224_s3 = scalar_lea.hbm %s670_s2, %s326_s28  ;;  %s210_s4 = scalar_lea.sflag [#allocation6], %s612_s17 }
  0x2f   : > { %v168_v4 = vsel %vm160_vm0, %v158_v1, -inf  ;;  %s424_s5 = scalar_lea.vmem %s227_s27, 128  ;;  %s507_s6 = smov [#allocation7]  }
  0x30   : > { %v163_v5 = vmax.f32 %v161_v2, %v162_v3  ;;  %v169_v6 = vrot.slane %v168_v4, 4  ;;  %p425_p8 = scmp.ne.s32.totalorder %s227_s27, %s424_s5  ;;  %s428_s7 = sshll.u32 %s507_s6, 4  ;;  %s429_s7 = int_to_ptr.vmem [resolvable:$false] %s428_s7 }
  0x31   : > { %s430_s8 = scalar_lea.vmem %s429_s7, 256  ;;  %p431_p0 = scmp.lt.s32.totalorder %s227_s27, %s429_s7 }
  0x32   : > { %v164_v7 = vrot.slane %v163_v5, 2  ;;  %v170_v8 = vmax.f32 %v168_v4, %v169_v6  ;;  %v180_v17 = vstv %s155_s26  ;;  %p426_p11 = pnand %p425_p8, %p577_p9  ;;  %p432_p1 = scmp.lt.s32.totalorder %s430_s8, %s424_s5 }
  0x34   : > { %v165_v9 = vmax.f32 %v163_v5, %v164_v7  ;;  %v171_v10 = vrot.slane %v170_v8, 2  ;;  %p427_p12 = pneg %p426_p11  ;;  %p433_p2 = por %p432_p1, %p431_p0 }
  0x36   : > { %v166_v11 = vrot.slane %v165_v9, 1  ;;  %v172_v12 = vmax.f32 %v170_v8, %v171_v10  ;;  %p434_p3 = pnand %p433_p2, %p427_p12 }
  0x38   : > { %v167_v13 = vmax.f32 %v165_v9, %v166_v11  ;;  %v173_v14 = vrot.slane %v172_v12, 1 }
  0x3a   : > { %v174_v15 = vmax.f32 %v172_v12, %v173_v14 }
  0x3c   : > { %v177_v16 = vcombine.low %v167_v13, %v174_v15 }
  0x3e   : > { %v179_v18 = vsub.f32 %v156_v0, %v177_v16 }
  0x40   : > { %v181_v19 = vmul.f32 %v180_v17, %v179_v18 }
  0x42   : > { %v182_v20 = vmul.f32 1.442695, %v181_v19 }
  0x44   : > { %390 = vpow2.f32 %v182_v20 }
  0x51   : > { %v391_v21 = vpop.eup %390 }
  0x52   : > { %v185_v22 = vcombine.high %v391_v21, %v391_v21  ;;  %v187_v23 = vsel %vm160_vm0, %v391_v21, 0.0 }
  0x53   : > { %v188_v24 = vrot.slane %v187_v23, 4 }
  0x54   : > { %v194_v25 = vsel %vm160_vm0, %v185_v22, 0.0 }
  0x55   : > { %v189_v26 = vadd.f32 %v188_v24, %v187_v23  ;;  %v195_v27 = vrot.slane %v194_v25, 4 }
  0x57   : > { %v190_v28 = vrot.slane %v189_v26, 2  ;;  %v196_v29 = vadd.f32 %v195_v27, %v194_v25 }
  0x59   : > { %v197_v30 = vrot.slane %v196_v29, 2  ;;  %v191_v31 = vadd.f32 %v190_v28, %v189_v26 }
  0x5b   : > { %v192_v32 = vrot.slane %v191_v31, 1  ;;  %v198_v33 = vadd.f32 %v197_v30, %v196_v29 }
  0x5d   : > { %v193_v34 = vadd.f32 %v192_v32, %v191_v31  ;;  %v199_v35 = vrot.slane %v198_v33, 1 }
  0x5f   : > { %v200_v36 = vadd.f32 %v199_v35, %v198_v33  ;;  %392 = vrcp.f32 %v193_v34 }
  0x61   : > { %394 = vrcp.f32 %v200_v36 }
  0x6c   : > { %v393_v37 = vpop.eup %392 }
  0x6e   : > { %v395_v38 = vpop.eup %394 }
  0x6f   : > { %v205_v39 = vcombine.low %v393_v37, %v395_v38 }
  0x71   : > { %v207_v40 = vmul.f32 %v391_v21, %v205_v39 }
  0x73   : > { %208 = vst [vmem:[%s152_s22] sm:$0xff] %v207_v40 }
  0x74   : > { %437 = shalt.err (!%p434_p3)
}
  0x75   : > { %s438_s14 = scalar_lea.hbm %s224_s3, 128  ;;  %s442_s0 = scalar_lea.hbm %s670_s2, 256 }
  0x76   : > { %p439_p5 = scmp.ne.s32.totalorder %s224_s3, %s438_s14  ;;  %p443_p10 = scmp.lt.s32.totalorder %s224_s3, %s670_s2 }
  0x77   : > { %p444_p4 = scmp.lt.s32.totalorder %s442_s0, %s438_s14 }
  0x78   : > { %p440_p6 = pnand %p439_p5, %p577_p9 }
  0x79   : > { %p445_p13 = por %p444_p4, %p443_p10 }
  0x7a   : > { %p441_p7 = pneg %p440_p6 }
  0x7c   : > { %p446_p8 = pnand %p445_p13, %p441_p7 }
  0x7e   : > { %449 = shalt.err (!%p446_p8)
}
  0x7f   : > { %329 = dma.vmem_to_hbm [thread:$0]  (%p577_p9), %s227_s27, 128, %s224_s3, %s210_s4  }
  0x80 PF: > { %s238_s20 = sand.u32 1, %s484_s11   ;;  %p676_p11 = scmp.ne.s32.totalorder %s674_s25, 0 }
  0x81   : > { %p677_p12 = scmp.ge.s32.totalorder %s504_s16, 2  ;;  %s239_s21 = scalar_lea.sflag [#allocation6], %s238_s20 }
  0x83   : > { %p336_p0 = pnand %p677_p12, %p676_p11 }
  0x85   : > { %p337_p1 = pneg %p336_p0 }
  0x87   : > { %479 = dma.done.wait (%p337_p1), %s239_s21, 128  }
  0x88   : > { %481 = vsyncadd (%p337_p1), %s239_s21, 4294967168  ;;  %s19_s16 = sadd.s32 1, %s504_s16   ;;  %s678_s11 = smov %s488_s12 }
  0x89   : > { %p16_p2 = scmp.ge.s32.totalorder %s19_s16, 4   ;;  %s679_s12 = smov %s492_s13 }
  0x8a   : > { %s680_s13 = smov %s582_s24  ;;  %s681_s14 = smov %s500_s15 }
  0x8b   : > { %s682_s15 = smov %s684_s18  ;;  %18 = sbr.rel (!%p16_p2) target bundleno = 8 (0x8), region = 69 }
  0x90   :  { %244 = vsyncpa [#allocation5], 1 }
  0x91   :  { %246 = vsyncpa [#allocation5 + $0x1], 1 }
  0x92   :  { %247 = vsyncpa [#allocation6], 1 }
  0x93   :  { %249 = vsyncpa [#allocation6 + $0x1], 1 }

</bundles_post_ra>
